<compile_context>
chip_gen: v5e
topology: v5e:2x2
jax: 0.10.0
libtpu: 0.0.40
codegen_flags: <defaults>
</compile_context>

<pallas_src>
import jax
import jax.numpy as jnp
from jax import lax
from jax.experimental import pallas as pl
from jax.experimental.pallas import tpu as pltpu

EPS = 1e-5


def _make_row_toeplitz(w_hwio, W):
    """(3,3,Cin,Cout) HWIO conv weight -> (3, W*Cin, W*Cout) per-kernel-row block-Toeplitz
    matrices.  Zero padding along W is folded in (out-of-range taps simply have no entry)."""
    kh, kw, cin, cout = w_hwio.shape
    wi = jnp.arange(W)[:, None]          # input pixel index
    wo = jnp.arange(W)[None, :]          # output pixel index
    taps = []
    for ky in range(kh):
        t = jnp.zeros((W, cin, W, cout), w_hwio.dtype)
        for kx in range(kw):
            sel = (wi == wo + (kx - 1)).astype(w_hwio.dtype)                 # (W, W)
            t = t + sel[:, None, :, None] * w_hwio[ky, kx][None, :, None, :]
        taps.append(t.reshape(W * cin, W * cout))
    return jnp.stack(taps, axis=0)


def _make_kernel(N, H, W, Cout):
    L = W * Cout
    inv_cnt = 1.0 / float(N * H * W)     # BN stats: every channel sees N*H*W pixels

    def stage(x_f32, t_ref, gamma, beta, fold, mask_top, mask_bot):
        # --- 3x3 conv: three fat MXU matmuls (one per kernel row), bf16 operands, f32 acc ---
        xb = x_f32.astype(jnp.bfloat16)
        mid = jnp.dot(xb, t_ref[1], preferred_element_type=jnp.float32)  # tap ky=1 (same row)
        up = jnp.dot(xb, t_ref[0], preferred_element_type=jnp.float32)   # tap ky=0 (row above)
        dn = jnp.dot(xb, t_ref[2], preferred_element_type=jnp.float32)   # tap ky=2 (row below)
        zrow = jnp.zeros((1, L), jnp.float32)
        up_sh = jnp.concatenate([zrow, up[:-1, :]], axis=0)    # out[h] += up[h-1]
        dn_sh = jnp.concatenate([dn[1:, :], zrow], axis=0)     # out[h] += dn[h+1]
        acc = mid + up_sh * mask_top + dn_sh * mask_bot        # masks zero the H halo rows

        # --- BatchNorm2d (training mode): per-channel mean / biased variance ---
        colsum = jnp.sum(acc, axis=0, keepdims=True)            # (1, W*Cout) per-lane sums
        colsq = jnp.sum(acc * acc, axis=0, keepdims=True)
        stats = jnp.concatenate(
            [colsum, colsq, jnp.zeros((6, L), jnp.float32)], axis=0)        # (8, L) aligned M
        stats = jnp.dot(stats, fold, preferred_element_type=jnp.float32)    # fold W, re-broadcast
        mean = stats[0:1, :] * inv_cnt
        var = stats[1:2, :] * inv_cnt - mean * mean
        scale = gamma * lax.rsqrt(var + EPS)
        shift = beta - mean * scale

        # --- normalize + affine + ReLU (lane-dense f32 VPU work) ---
        return jnp.maximum(acc * scale + shift, 0.0)

    def kernel(x_ref, t1_ref, t2_ref, fold_ref, m_ref, p_ref, o_ref):
        fold = fold_ref[...]
        mtop = m_ref[0]
        mbot = m_ref[1]
        p = p_ref[...]
        h1 = stage(x_ref[...], t1_ref, p[0:1, :], p[1:2, :], fold, mtop, mbot)
        h2 = stage(h1, t2_ref, p[2:3, :], p[3:4, :], fold, mtop, mbot)
        o_ref[...] = h2

    return kernel


@jax.jit
def conv_block_forward(x_nchw, p):
    N, Cin, H, W = x_nchw.shape
    Cout = p["w1"].shape[-1]
    L = W * Cout
    NH = N * H

    # NCHW -> lane-dense row slab (N*H, W*Cin): lane axis carries width*channels.
    x2d = jnp.transpose(x_nchw, (0, 2, 3, 1)).reshape(NH, W * Cin)

    # Conv weights as per-kernel-row block-Toeplitz matrices, bf16 for the MXU.
    t1 = _make_row_toeplitz(p["w1"], W).astype(jnp.bfloat16)   # (3, W*Cin,  W*Cout)
    t2 = _make_row_toeplitz(p["w2"], W).astype(jnp.bfloat16)   # (3, W*Cout, W*Cout)

    # Channel fold/broadcast matrix: out lane (w,c) = sum over w' of in lane (w',c).
    fold = jnp.kron(jnp.ones((W, W), jnp.float32), jnp.eye(Cout, dtype=jnp.float32))

    # Lane-dense row masks for the H halo (kill the tap that would cross an image boundary).
    rows = jnp.tile(jnp.arange(H), N)
    mtop = jnp.broadcast_to((rows != 0).astype(jnp.float32)[:, None], (NH, L))
    mbot = jnp.broadcast_to((rows != H - 1).astype(jnp.float32)[:, None], (NH, L))
    masks = jnp.stack([mtop, mbot], axis=0)                    # (2, N*H, L)

    # BN affine params packed into one sublane-aligned slab (8, L); lane layout w*Cout + c.
    bn = jnp.zeros((8, L), jnp.float32)
    bn = bn.at[0].set(jnp.tile(p["g1"], W))
    bn = bn.at[1].set(jnp.tile(p["be1"], W))
    bn = bn.at[2].set(jnp.tile(p["g2"], W))
    bn = bn.at[3].set(jnp.tile(p["be2"], W))
    # NOTE: conv biases p["b1"] / p["b2"] are intentionally NOT passed to the kernel:
    # train-mode BatchNorm subtracts the per-channel mean, so the bias cancels exactly.

    out2d = pl.pallas_call(
        _make_kernel(N, H, W, Cout),
        out_shape=jax.ShapeDtypeStruct((NH, L), jnp.float32),
        grid_spec=pltpu.PrefetchScalarGridSpec(
            num_scalar_prefetch=0,
            grid=(1,),
            in_specs=[
                pl.BlockSpec((NH, W * Cin), lambda i: (0, 0)),
                pl.BlockSpec((3, W * Cin, L), lambda i: (0, 0, 0)),
                pl.BlockSpec((3, L, L), lambda i: (0, 0, 0)),
                pl.BlockSpec((L, L), lambda i: (0, 0)),
                pl.BlockSpec((2, NH, L), lambda i: (0, 0, 0)),
                pl.BlockSpec((8, L), lambda i: (0, 0)),
            ],
            out_specs=pl.BlockSpec((NH, L), lambda i: (0, 0)),
        ),
        compiler_params=pltpu.CompilerParams(
            dimension_semantics=("arbitrary",),
            vmem_limit_bytes=64 * 1024 * 1024,
        ),
    )(x2d, t1, t2, fold, masks, bn)

    # slab (N*H, W*Cout) -> NCHW (PyTorch output convention)
    return jnp.transpose(out2d.reshape(N, H, W, Cout), (0, 3, 1, 2))


def init_params(key, in_channels, out_channels):
    k1, k2, k3, k4 = jax.random.split(key, 4)
    return {
        "w1": 0.1 * jax.random.normal(k1, (3, 3, in_channels, out_channels), jnp.float32),
        "b1": 0.1 * jax.random.normal(k2, (out_channels,), jnp.float32),
        "g1": jnp.ones((out_channels,), jnp.float32),
        "be1": jnp.zeros((out_channels,), jnp.float32),
        "w2": 0.1 * jax.random.normal(k3, (3, 3, out_channels, out_channels), jnp.float32),
        "b2": 0.1 * jax.random.normal(k4, (out_channels,), jnp.float32),
        "g2": jnp.ones((out_channels,), jnp.float32),
        "be2": jnp.zeros((out_channels,), jnp.float32),
    }


# ---------------- pure-JAX reference (verification only) ----------------
def _ref_stage(x, w, b, g, beta, matmul_dtype):
    y = lax.conv_general_dilated(
        x.astype(matmul_dtype), w.astype(matmul_dtype),
        window_strides=(1, 1), padding=((1, 1), (1, 1)),
        dimension_numbers=("NHWC", "HWIO", "NHWC"),
        preferred_element_type=jnp.float32)
    y = y + b.reshape(1, 1, 1, -1)
    m = jnp.mean(y, axis=(0, 1, 2), keepdims=True)
    v = jnp.mean((y - m) ** 2, axis=(0, 1, 2), keepdims=True)
    y = (y - m) * lax.rsqrt(v + EPS) * g.reshape(1, 1, 1, -1) + beta.reshape(1, 1, 1, -1)
    return jnp.maximum(y, 0.0)


def conv_block_ref(x_nchw, p, matmul_dtype=jnp.float32):
    x = jnp.transpose(x_nchw, (0, 2, 3, 1))
    h = _ref_stage(x, p["w1"], p["b1"], p["g1"], p["be1"], matmul_dtype)
    h = _ref_stage(h, p["w2"], p["b2"], p["g2"], p["be2"], matmul_dtype)
    return jnp.transpose(h, (0, 3, 1, 2))


if __name__ == "__main__":
    key = jax.random.PRNGKey(0)
    kx, kp = jax.random.split(key)

    batch, in_channels, out_channels, spatial = 2, 4, 8, 16
    x = jax.random.normal(kx, (batch, in_channels, spatial, spatial), jnp.float32)
    params = init_params(kp, in_channels, out_channels)

    out = jax.block_until_ready(conv_block_forward(x, params))
    assert out.shape == (batch, out_channels, spatial, spatial), out.shape

    # Check vs. a reference using the same bf16 matmul operands (f32 accumulation).
    ref_bf16 = conv_block_ref(x, params, jnp.bfloat16)
    err_bf16 = float(jnp.max(jnp.abs(out - ref_bf16)))
    assert jnp.allclose(out, ref_bf16, atol=2e-2, rtol=2e-2), err_bf16

    # Loose sanity check vs. the pure-f32 reference (bf16 MXU operands are a precision choice).
    ref_f32 = conv_block_ref(x, params, jnp.float32)
    err_f32 = float(jnp.max(jnp.abs(out - ref_f32)))
    assert jnp.allclose(out, ref_f32, atol=1e-1, rtol=1e-1), err_f32

    print("KERNEL_OK")
</pallas_src>

<mosaic_0001>
module attributes {stable_mosaic.version = 11 : i64} {
  func.func @kernel(%arg0: i32, %arg1: memref<32x64xf32, #tpu.memory_space<vmem>>, %arg2: memref<3x64x128xbf16, #tpu.memory_space<vmem>>, %arg3: memref<3x128x128xbf16, #tpu.memory_space<vmem>>, %arg4: memref<128x128xf32, #tpu.memory_space<vmem>>, %arg5: memref<2x32x128xf32, #tpu.memory_space<vmem>>, %arg6: memref<8x128xf32, #tpu.memory_space<vmem>>, %arg7: memref<32x128xf32, #tpu.memory_space<vmem>>) attributes {dimension_semantics = [#tpu.dimension_semantics<arbitrary>], iteration_bounds = array<i64: 1>, scalar_prefetch = 0 : i64, scratch_operands = 0 : i64, tpu.core_type = #tpu.core_type<tc>, window_params = [{pipeline_mode = #tpu.pipeline_mode<synchronous>, transform_indices = @transform_0, window_bounds = array<i64: 32, 64>}, {pipeline_mode = #tpu.pipeline_mode<synchronous>, transform_indices = @transform_1, window_bounds = array<i64: 3, 64, 128>}, {pipeline_mode = #tpu.pipeline_mode<synchronous>, transform_indices = @transform_2, window_bounds = array<i64: 3, 128, 128>}, {pipeline_mode = #tpu.pipeline_mode<synchronous>, transform_indices = @transform_3, window_bounds = array<i64: 128, 128>}, {pipeline_mode = #tpu.pipeline_mode<synchronous>, transform_indices = @transform_4, window_bounds = array<i64: 2, 32, 128>}, {pipeline_mode = #tpu.pipeline_mode<synchronous>, transform_indices = @transform_5, window_bounds = array<i64: 8, 128>}, {pipeline_mode = #tpu.pipeline_mode<synchronous>, transform_indices = @transform_6, window_bounds = array<i64: 32, 128>}]} {
    %c0 = arith.constant 0 : index
    %c0_0 = arith.constant 0 : index
    %0 = vector.load %arg4[%c0, %c0_0] : memref<128x128xf32, #tpu.memory_space<vmem>>, vector<128x128xf32>
    %c0_1 = arith.constant 0 : index
    %c0_2 = arith.constant 0 : index
    %c0_3 = arith.constant 0 : index
    %1 = vector.load %arg5[%c0_1, %c0_2, %c0_3] : memref<2x32x128xf32, #tpu.memory_space<vmem>>, vector<1x32x128xf32>
    %2 = vector.shape_cast %1 : vector<1x32x128xf32> to vector<32x128xf32>
    %c1 = arith.constant 1 : index
    %c0_4 = arith.constant 0 : index
    %c0_5 = arith.constant 0 : index
    %3 = vector.load %arg5[%c1, %c0_4, %c0_5] : memref<2x32x128xf32, #tpu.memory_space<vmem>>, vector<1x32x128xf32>
    %4 = vector.shape_cast %3 : vector<1x32x128xf32> to vector<32x128xf32>
    %c0_6 = arith.constant 0 : index
    %c0_7 = arith.constant 0 : index
    %5 = vector.load %arg6[%c0_6, %c0_7] : memref<8x128xf32, #tpu.memory_space<vmem>>, vector<8x128xf32>
    %c0_8 = arith.constant 0 : index
    %c0_9 = arith.constant 0 : index
    %6 = vector.load %arg1[%c0_8, %c0_9] : memref<32x64xf32, #tpu.memory_space<vmem>>, vector<32x64xf32>
    %7 = vector.extract_strided_slice %5 {offsets = [0, 0], sizes = [1, 128], strides = [1, 1]} : vector<8x128xf32> to vector<1x128xf32>
    %8 = vector.extract_strided_slice %5 {offsets = [1, 0], sizes = [1, 128], strides = [1, 1]} : vector<8x128xf32> to vector<1x128xf32>
    %9 = arith.truncf %6 : vector<32x64xf32> to vector<32x64xbf16>
    %c1_10 = arith.constant 1 : index
    %c0_11 = arith.constant 0 : index
    %c0_12 = arith.constant 0 : index
    %10 = vector.load %arg2[%c1_10, %c0_11, %c0_12] : memref<3x64x128xbf16, #tpu.memory_space<vmem>>, vector<1x64x128xbf16>
    %11 = vector.shape_cast %10 : vector<1x64x128xbf16> to vector<64x128xbf16>
    %cst = arith.constant dense<0.000000e+00> : vector<32x128xf32>
    %12 = tpu.matmul %9, %11, %cst {dimension_numbers = #tpu.dot_dimension_numbers<[1], [0], [0], [1], [0, 0, 1, 1], [], []>} : vector<32x64xbf16>, vector<64x128xbf16>, vector<32x128xf32> -> vector<32x128xf32>
    %c0_13 = arith.constant 0 : index
    %c0_14 = arith.constant 0 : index
    %c0_15 = arith.constant 0 : index
    %13 = vector.load %arg2[%c0_13, %c0_14, %c0_15] : memref<3x64x128xbf16, #tpu.memory_space<vmem>>, vector<1x64x128xbf16>
    %14 = vector.shape_cast %13 : vector<1x64x128xbf16> to vector<64x128xbf16>
    %cst_16 = arith.constant dense<0.000000e+00> : vector<32x128xf32>
    %15 = tpu.matmul %9, %14, %cst_16 {dimension_numbers = #tpu.dot_dimension_numbers<[1], [0], [0], [1], [0, 0, 1, 1], [], []>} : vector<32x64xbf16>, vector<64x128xbf16>, vector<32x128xf32> -> vector<32x128xf32>
    %c2 = arith.constant 2 : index
    %c0_17 = arith.constant 0 : index
    %c0_18 = arith.constant 0 : index
    %16 = vector.load %arg2[%c2, %c0_17, %c0_18] : memref<3x64x128xbf16, #tpu.memory_space<vmem>>, vector<1x64x128xbf16>
    %17 = vector.shape_cast %16 : vector<1x64x128xbf16> to vector<64x128xbf16>
    %cst_19 = arith.constant dense<0.000000e+00> : vector<32x128xf32>
    %18 = tpu.matmul %9, %17, %cst_19 {dimension_numbers = #tpu.dot_dimension_numbers<[1], [0], [0], [1], [0, 0, 1, 1], [], []>} : vector<32x64xbf16>, vector<64x128xbf16>, vector<32x128xf32> -> vector<32x128xf32>
    %cst_20 = arith.constant 0.000000e+00 : f32
    %19 = vector.broadcast %cst_20 : f32 to vector<1x128xf32>
    %20 = vector.extract_strided_slice %15 {offsets = [0, 0], sizes = [31, 128], strides = [1, 1]} : vector<32x128xf32> to vector<31x128xf32>
    %21 = tpu.concatenate %19, %20 in 0 : vector<1x128xf32>, vector<31x128xf32> -> vector<32x128xf32>
    %22 = vector.extract_strided_slice %18 {offsets = [1, 0], sizes = [31, 128], strides = [1, 1]} : vector<32x128xf32> to vector<31x128xf32>
    %23 = tpu.concatenate %22, %19 in 0 : vector<31x128xf32>, vector<1x128xf32> -> vector<32x128xf32>
    %24 = arith.mulf %21, %2 : vector<32x128xf32>
    %25 = arith.addf %12, %24 : vector<32x128xf32>
    %26 = arith.mulf %23, %4 : vector<32x128xf32>
    %27 = arith.addf %25, %26 : vector<32x128xf32>
    %cst_21 = arith.constant dense<0.000000e+00> : vector<128xf32>
    %28 = vector.multi_reduction <add>, %27, %cst_21 [0] : vector<32x128xf32> to vector<128xf32>
    %29 = vector.shape_cast %28 : vector<128xf32> to vector<1x128xf32>
    %30 = arith.mulf %27, %27 : vector<32x128xf32>
    %cst_22 = arith.constant dense<0.000000e+00> : vector<128xf32>
    %31 = vector.multi_reduction <add>, %30, %cst_22 [0] : vector<32x128xf32> to vector<128xf32>
    %32 = vector.shape_cast %31 : vector<128xf32> to vector<1x128xf32>
    %cst_23 = arith.constant 0.000000e+00 : f32
    %33 = vector.broadcast %cst_23 : f32 to vector<6x128xf32>
    %34 = tpu.concatenate %29, %32, %33 in 0 : vector<1x128xf32>, vector<1x128xf32>, vector<6x128xf32> -> vector<8x128xf32>
    %cst_24 = arith.constant dense<0.000000e+00> : vector<8x128xf32>
    %35 = tpu.matmul %34, %0, %cst_24 {dimension_numbers = #tpu.dot_dimension_numbers<[1], [0], [0], [1], [0, 0, 1, 1], [], []>} : vector<8x128xf32>, vector<128x128xf32>, vector<8x128xf32> -> vector<8x128xf32>
    %36 = vector.extract_strided_slice %35 {offsets = [0, 0], sizes = [1, 128], strides = [1, 1]} : vector<8x128xf32> to vector<1x128xf32>
    %cst_25 = arith.constant 0.001953125 : f32
    %37 = vector.broadcast %cst_25 : f32 to vector<1x128xf32>
    %38 = arith.mulf %36, %37 : vector<1x128xf32>
    %39 = vector.extract_strided_slice %35 {offsets = [1, 0], sizes = [1, 128], strides = [1, 1]} : vector<8x128xf32> to vector<1x128xf32>
    %cst_26 = arith.constant 0.001953125 : f32
    %40 = vector.broadcast %cst_26 : f32 to vector<1x128xf32>
    %41 = arith.mulf %39, %40 : vector<1x128xf32>
    %42 = arith.mulf %38, %38 : vector<1x128xf32>
    %43 = arith.subf %41, %42 : vector<1x128xf32>
    %cst_27 = arith.constant 9.99999974E-6 : f32
    %44 = vector.broadcast %cst_27 : f32 to vector<1x128xf32>
    %45 = arith.addf %43, %44 : vector<1x128xf32>
    %46 = math.rsqrt %45 : vector<1x128xf32>
    %47 = arith.mulf %7, %46 : vector<1x128xf32>
    %48 = arith.mulf %38, %47 : vector<1x128xf32>
    %49 = arith.subf %8, %48 : vector<1x128xf32>
    %50 = vector.broadcast %47 : vector<1x128xf32> to vector<32x128xf32>
    %51 = arith.mulf %27, %50 : vector<32x128xf32>
    %52 = vector.broadcast %49 : vector<1x128xf32> to vector<32x128xf32>
    %53 = arith.addf %51, %52 : vector<32x128xf32>
    %cst_28 = arith.constant 0.000000e+00 : f32
    %54 = vector.broadcast %cst_28 : f32 to vector<32x128xf32>
    %55 = arith.maximumf %53, %54 : vector<32x128xf32>
    %56 = vector.extract_strided_slice %5 {offsets = [2, 0], sizes = [1, 128], strides = [1, 1]} : vector<8x128xf32> to vector<1x128xf32>
    %57 = vector.extract_strided_slice %5 {offsets = [3, 0], sizes = [1, 128], strides = [1, 1]} : vector<8x128xf32> to vector<1x128xf32>
    %58 = arith.truncf %55 : vector<32x128xf32> to vector<32x128xbf16>
    %c1_29 = arith.constant 1 : index
    %c0_30 = arith.constant 0 : index
    %c0_31 = arith.constant 0 : index
    %59 = vector.load %arg3[%c1_29, %c0_30, %c0_31] : memref<3x128x128xbf16, #tpu.memory_space<vmem>>, vector<1x128x128xbf16>
    %60 = vector.shape_cast %59 : vector<1x128x128xbf16> to vector<128x128xbf16>
    %cst_32 = arith.constant dense<0.000000e+00> : vector<32x128xf32>
    %61 = tpu.matmul %58, %60, %cst_32 {dimension_numbers = #tpu.dot_dimension_numbers<[1], [0], [0], [1], [0, 0, 1, 1], [], []>} : vector<32x128xbf16>, vector<128x128xbf16>, vector<32x128xf32> -> vector<32x128xf32>
    %c0_33 = arith.constant 0 : index
    %c0_34 = arith.constant 0 : index
    %c0_35 = arith.constant 0 : index
    %62 = vector.load %arg3[%c0_33, %c0_34, %c0_35] : memref<3x128x128xbf16, #tpu.memory_space<vmem>>, vector<1x128x128xbf16>
    %63 = vector.shape_cast %62 : vector<1x128x128xbf16> to vector<128x128xbf16>
    %cst_36 = arith.constant dense<0.000000e+00> : vector<32x128xf32>
    %64 = tpu.matmul %58, %63, %cst_36 {dimension_numbers = #tpu.dot_dimension_numbers<[1], [0], [0], [1], [0, 0, 1, 1], [], []>} : vector<32x128xbf16>, vector<128x128xbf16>, vector<32x128xf32> -> vector<32x128xf32>
    %c2_37 = arith.constant 2 : index
    %c0_38 = arith.constant 0 : index
    %c0_39 = arith.constant 0 : index
    %65 = vector.load %arg3[%c2_37, %c0_38, %c0_39] : memref<3x128x128xbf16, #tpu.memory_space<vmem>>, vector<1x128x128xbf16>
    %66 = vector.shape_cast %65 : vector<1x128x128xbf16> to vector<128x128xbf16>
    %cst_40 = arith.constant dense<0.000000e+00> : vector<32x128xf32>
    %67 = tpu.matmul %58, %66, %cst_40 {dimension_numbers = #tpu.dot_dimension_numbers<[1], [0], [0], [1], [0, 0, 1, 1], [], []>} : vector<32x128xbf16>, vector<128x128xbf16>, vector<32x128xf32> -> vector<32x128xf32>
    %cst_41 = arith.constant 0.000000e+00 : f32
    %68 = vector.broadcast %cst_41 : f32 to vector<1x128xf32>
    %69 = vector.extract_strided_slice %64 {offsets = [0, 0], sizes = [31, 128], strides = [1, 1]} : vector<32x128xf32> to vector<31x128xf32>
    %70 = tpu.concatenate %68, %69 in 0 : vector<1x128xf32>, vector<31x128xf32> -> vector<32x128xf32>
    %71 = vector.extract_strided_slice %67 {offsets = [1, 0], sizes = [31, 128], strides = [1, 1]} : vector<32x128xf32> to vector<31x128xf32>
    %72 = tpu.concatenate %71, %68 in 0 : vector<31x128xf32>, vector<1x128xf32> -> vector<32x128xf32>
    %73 = arith.mulf %70, %2 : vector<32x128xf32>
    %74 = arith.addf %61, %73 : vector<32x128xf32>
    %75 = arith.mulf %72, %4 : vector<32x128xf32>
    %76 = arith.addf %74, %75 : vector<32x128xf32>
    %cst_42 = arith.constant dense<0.000000e+00> : vector<128xf32>
    %77 = vector.multi_reduction <add>, %76, %cst_42 [0] : vector<32x128xf32> to vector<128xf32>
    %78 = vector.shape_cast %77 : vector<128xf32> to vector<1x128xf32>
    %79 = arith.mulf %76, %76 : vector<32x128xf32>
    %cst_43 = arith.constant dense<0.000000e+00> : vector<128xf32>
    %80 = vector.multi_reduction <add>, %79, %cst_43 [0] : vector<32x128xf32> to vector<128xf32>
    %81 = vector.shape_cast %80 : vector<128xf32> to vector<1x128xf32>
    %cst_44 = arith.constant 0.000000e+00 : f32
    %82 = vector.broadcast %cst_44 : f32 to vector<6x128xf32>
    %83 = tpu.concatenate %78, %81, %82 in 0 : vector<1x128xf32>, vector<1x128xf32>, vector<6x128xf32> -> vector<8x128xf32>
    %cst_45 = arith.constant dense<0.000000e+00> : vector<8x128xf32>
    %84 = tpu.matmul %83, %0, %cst_45 {dimension_numbers = #tpu.dot_dimension_numbers<[1], [0], [0], [1], [0, 0, 1, 1], [], []>} : vector<8x128xf32>, vector<128x128xf32>, vector<8x128xf32> -> vector<8x128xf32>
    %85 = vector.extract_strided_slice %84 {offsets = [0, 0], sizes = [1, 128], strides = [1, 1]} : vector<8x128xf32> to vector<1x128xf32>
    %cst_46 = arith.constant 0.001953125 : f32
    %86 = vector.broadcast %cst_46 : f32 to vector<1x128xf32>
    %87 = arith.mulf %85, %86 : vector<1x128xf32>
    %88 = vector.extract_strided_slice %84 {offsets = [1, 0], sizes = [1, 128], strides = [1, 1]} : vector<8x128xf32> to vector<1x128xf32>
    %cst_47 = arith.constant 0.001953125 : f32
    %89 = vector.broadcast %cst_47 : f32 to vector<1x128xf32>
    %90 = arith.mulf %88, %89 : vector<1x128xf32>
    %91 = arith.mulf %87, %87 : vector<1x128xf32>
    %92 = arith.subf %90, %91 : vector<1x128xf32>
    %cst_48 = arith.constant 9.99999974E-6 : f32
    %93 = vector.broadcast %cst_48 : f32 to vector<1x128xf32>
    %94 = arith.addf %92, %93 : vector<1x128xf32>
    %95 = math.rsqrt %94 : vector<1x128xf32>
    %96 = arith.mulf %56, %95 : vector<1x128xf32>
    %97 = arith.mulf %87, %96 : vector<1x128xf32>
    %98 = arith.subf %57, %97 : vector<1x128xf32>
    %99 = vector.broadcast %96 : vector<1x128xf32> to vector<32x128xf32>
    %100 = arith.mulf %76, %99 : vector<32x128xf32>
    %101 = vector.broadcast %98 : vector<1x128xf32> to vector<32x128xf32>
    %102 = arith.addf %100, %101 : vector<32x128xf32>
    %cst_49 = arith.constant 0.000000e+00 : f32
    %103 = vector.broadcast %cst_49 : f32 to vector<32x128xf32>
    %104 = arith.maximumf %102, %103 : vector<32x128xf32>
    %c0_50 = arith.constant 0 : index
    %c0_51 = arith.constant 0 : index
    %105 = vector.load %arg7[%c0_50, %c0_51] : memref<32x128xf32, #tpu.memory_space<vmem>>, vector<32x128xf32>
    tpu.vector_store %arg7[%c0_50, %c0_51], %104 {strides = array<i32>} : memref<32x128xf32, #tpu.memory_space<vmem>>, vector<32x128xf32>,
    return
  }
  func.func @transform_0(%arg0: i32) -> (i32, i32) {
    %c0_i32 = arith.constant 0 : i32
    %c0_i32_0 = arith.constant 0 : i32
    %c0_i32_1 = arith.constant 0 : i32
    return %c0_i32, %c0_i32_0 : i32, i32
  }
  func.func @transform_1(%arg0: i32) -> (i32, i32, i32) {
    %c0_i32 = arith.constant 0 : i32
    %c0_i32_0 = arith.constant 0 : i32
    %c0_i32_1 = arith.constant 0 : i32
    %c0_i32_2 = arith.constant 0 : i32
    return %c0_i32, %c0_i32_0, %c0_i32_1 : i32, i32, i32
  }
  func.func @transform_2(%arg0: i32) -> (i32, i32, i32) {
    %c0_i32 = arith.constant 0 : i32
    %c0_i32_0 = arith.constant 0 : i32
    %c0_i32_1 = arith.constant 0 : i32
    %c0_i32_2 = arith.constant 0 : i32
    return %c0_i32, %c0_i32_0, %c0_i32_1 : i32, i32, i32
  }
  func.func @transform_3(%arg0: i32) -> (i32, i32) {
    %c0_i32 = arith.constant 0 : i32
    %c0_i32_0 = arith.constant 0 : i32
    %c0_i32_1 = arith.constant 0 : i32
    return %c0_i32, %c0_i32_0 : i32, i32
  }
  func.func @transform_4(%arg0: i32) -> (i32, i32, i32) {
    %c0_i32 = arith.constant 0 : i32
    %c0_i32_0 = arith.constant 0 : i32
    %c0_i32_1 = arith.constant 0 : i32
    %c0_i32_2 = arith.constant 0 : i32
    return %c0_i32, %c0_i32_0, %c0_i32_1 : i32, i32, i32
  }
  func.func @transform_5(%arg0: i32) -> (i32, i32) {
    %c0_i32 = arith.constant 0 : i32
    %c0_i32_0 = arith.constant 0 : i32
    %c0_i32_1 = arith.constant 0 : i32
    return %c0_i32, %c0_i32_0 : i32, i32
  }
  func.func @transform_6(%arg0: i32) -> (i32, i32) {
    %c0_i32 = arith.constant 0 : i32
    %c0_i32_0 = arith.constant 0 : i32
    %c0_i32_1 = arith.constant 0 : i32
    return %c0_i32, %c0_i32_0 : i32, i32
  }
}

</mosaic_0001>

<bundles_post_ra>
// kernel: tile.33
= control target key start
LH: loop header
LB: loop body
LE: loop exit
PB: predicated region body
PF: predicated region fallthrough
CT: control target
= control target key end

     0   :  { %s28_s0 = inlined_call_operand.vmem [shape: f32[8], index: 0, kind: input, shape index: {}]   ;;  %s29_s1 = inlined_call_operand.vmem [shape: f32[16,8], index: 1, kind: output, shape index: {}]  }
   0x1   :  { %v4_v0 = vld [vmem:[%s28_s0] ss:$0 sm:$0xff] }
   0x2   :  { %5 = vst [vmem:[%s29_s1] sm:$0xff] %v4_v0 }
   0x3   :  { %8 = vst [vmem:[%s29_s1 + $0x8] sm:$0xff] %v4_v0 }

// kernel: conv_block_forward.1
= control target key start
LH: loop header
LB: loop body
LE: loop exit
PB: predicated region body
PF: predicated region fallthrough
CT: control target
= control target key end

     0   :  { %vm97_vm0 = vcmask 523264   ;;  %vm179_vm1 = vcmask 1040384   ;;  %vm196_vm2 = vcmask 1046528   ;;  %vm287_vm3 = vcmask 1041408   ;;  %s1379_s1 = inlined_call_operand.vmem [shape: bf16[3,64,128], index: 1, kind: input, shape index: {}]   ;;  %s1380_s0 = inlined_call_operand.vmem [shape: f32[32,64], index: 0, kind: input, shape index: {}]   ;;  %s1381_s3 = inlined_call_operand.vmem [shape: f32[128,128], index: 3, kind: input, shape index: {}]   ;;  %s1382_s4 = inlined_call_operand.vmem [shape: f32[2,32,128], index: 4, kind: input, shape index: {}]   ;;  %s1383_s2 = inlined_call_operand.vmem [shape: bf16[3,128,128], index: 2, kind: input, shape index: {}]   ;;  %s1384_s5 = inlined_call_operand.vmem [shape: f32[8,128], index: 5, kind: input, shape index: {}]   ;;  %s1385_s6 = inlined_call_operand.vmem [shape: f32[32,128], index: 6, kind: output, shape index: {}]  }
   0x1   :  { %v952_v0 = vld [vmem:[%s1379_s1 + $0x18] sm:$0xff]  ;;  %v951_v3 = vld [vmem:[%s1379_s1 + $0x10] sm:$0xff]  ;;  %v950_v6 = vld [vmem:[%s1379_s1 + $0x8] sm:$0xff] }
   0x2   :  { %v956_v1 = vld [vmem:[%s1379_s1 + $0x58] sm:$0xff]  ;;  %108 = vmatpush.bf16.msra.mxu0 %v952_v0  ;;  %v955_v4 = vld [vmem:[%s1379_s1 + $0x50] sm:$0xff]  ;;  %v954_v7 = vld [vmem:[%s1379_s1 + $0x48] sm:$0xff] }
   0x3   :  { %v948_v2 = vld [vmem:[%s1379_s1 + $0x38] sm:$0xff]  ;;  %160 = vmatpush.bf16.msra.mxu1 %v956_v1  ;;  %v947_v5 = vld [vmem:[%s1379_s1 + $0x30] sm:$0xff]  ;;  %v946_v8 = vld [vmem:[%s1379_s1 + $0x28] sm:$0xff] }
   0x4   :  { %241 = vmatpush.bf16.msra.mxu2 %v948_v2  ;;  %v949_v9 = vld [vmem:[%s1379_s1] sm:$0xff]  ;;  %v51_v12 = vld [vmem:[%s1380_s0 + $0x8] sm:$0xff]  ;;  %v52_v15 = vld [vmem:[%s1380_s0 + $0x10] sm:$0xff] }
   0x5   :  { %v953_v10 = vld [vmem:[%s1379_s1 + $0x40] sm:$0xff]  ;;  %v53_v16 = vld [vmem:[%s1380_s0 + $0x18] sm:$0xff]  ;;  %v1077_v19 = vld [vmem:[%s1381_s3 + $0x70] sm:$0xff] }
   0x6   :  { %109 = vmatpush.bf16.msra.mxu0 %v951_v3  ;;  %v50_v11 = vld [vmem:[%s1380_s0] sm:$0xff]  ;;  %v55_v17 = vpack.c.bf16 %v53_v16, %v52_v15  ;;  %v1071_v18 = vld [vmem:[%s1381_s3 + $0x78] sm:$0xff]  ;;  %v1083_v20 = vld [vmem:[%s1381_s3 + $0x68] sm:$0xff] }
   0x7   :  { %161 = vmatpush.bf16.msra.mxu1 %v955_v4  ;;  %v945_v13 = vld [vmem:[%s1379_s1 + $0x20] sm:$0xff]  ;;  %v54_v14 = vpack.c.bf16 %v51_v12, %v50_v11  ;;  %289 = vmatpush.msra.mxu3 %v1071_v18  ;;  %v1095_v22 = vld [vmem:[%s1381_s3 + $0x58] sm:$0xff]  ;;  %v1101_v23 = vld [vmem:[%s1381_s3 + $0x50] sm:$0xff] }
   0x8   :  { %242 = vmatpush.bf16.msra.mxu2 %v947_v5  ;;  %v1089_v21 = vld [vmem:[%s1381_s3 + $0x60] sm:$0xff]  ;;  %v1107_v26 = vld [vmem:[%s1381_s3 + $0x48] sm:$0xff]  ;;  %v1119_v28 = vld [vmem:[%s1381_s3 + $0x38] sm:$0xff] }
   0x9   :  { %290 = vmatpush.msra.mxu3 %v1077_v19  ;;  %v1113_v27 = vld [vmem:[%s1381_s3 + $0x40] sm:$0xff]  ;;  %v1125_v30 = vld [vmem:[%s1381_s3 + $0x30] sm:$0xff]  ;;  %v1131_v33 = vld [vmem:[%s1381_s3 + $0x28] sm:$0xff] }
   0xa   :  { %110 = vmatpush.bf16.msra.mxu0 %v950_v6  ;;  %v1136_v34 = vld [vmem:[%s1381_s3 + $0x20] sm:$0xff]  ;;  %v1142_v36 = vld [vmem:[%s1381_s3 + $0x18] sm:$0xff]  ;;  %v1148_v38 = vld [vmem:[%s1381_s3 + $0x10] sm:$0xff] }
   0xb   :  { %162 = vmatpush.bf16.msra.mxu1 %v954_v7  ;;  %291 = vmatpush.msra.mxu3 %v1083_v20  ;;  %v1153_v40 = vld [vmem:[%s1382_s4 + $0x8] sm:$0xff]  ;;  %v1166_v46 = vld [vmem:[%s1382_s4] sm:$0xff]  ;;  %v1195_v61 = vld [vmem:[%s1382_s4 + $0x10] sm:$0xff] }
   0xc   :  { %243 = vmatpush.bf16.msra.mxu2 %v946_v8  ;;  %v1160_v43 = vld [vmem:[%s1381_s3 + $0x8] sm:$0xff]  ;;  %v1178_v53 = vld [vmem:[%s1381_s3] sm:$0xff]  ;;  %v1208_v7 = vld [vmem:[%s1382_s4 + $0x30] sm:$0xff] }
   0xd   :  { %292 = vmatpush.msra.mxu3 %v1089_v21  ;;  %v1173_v51 = vld [vmem:[%s1382_s4 + $0x28] sm:$0xff]  ;;  %v1183_v54 = vld [vmem:[%s1382_s4 + $0x20] sm:$0xff] }
   0xe   :  { %111 = vmatpush.bf16.msra.mxu0 %v949_v9  ;;  %v1213_v9 = vld [vmem:[%s1382_s4 + $0x18] sm:$0xff] }
   0xf   :  { %163 = vmatpush.bf16.msra.mxu1 %v953_v10  ;;  %293 = vmatpush.msra.mxu3 %v1095_v22 }
  0x10   :  { %244 = vmatpush.bf16.msra.mxu2 %v945_v13 }
  0x11   :  { %769 = vmatmul.msk.bf16.vlgmr.msra.gmra.mxu0 %vm97_vm0, %v54_v14  ;;  %294 = vmatpush.msra.mxu3 %v1101_v23 }
  0x12   :  { %795 = vmatmul.msk.bf16.vlgmr.msra.gmra.mxu1 %vm97_vm0, %v54_v14 }
  0x13   :  { %813 = vmatmul.msk.bf16.vlgmr.msra.gmra.mxu2 %vm97_vm0, %v54_v14  ;;  %295 = vmatpush.msra.mxu3 %v1107_v26 }
  0x15   :  { %296 = vmatpush.msra.mxu3 %v1113_v27 }
  0x17   :  { %297 = vmatpush.msra.mxu3 %v1119_v28 }
  0x19   :  { %298 = vmatpush.msra.mxu3 %v1125_v30 }
  0x1b   :  { %299 = vmatpush.msra.mxu3 %v1131_v33 }
  0x1d   :  { %300 = vmatpush.msra.mxu3 %v1136_v34 }
  0x1f   :  { %301 = vmatpush.msra.mxu3 %v1142_v36 }
  0x21   :  { %770 = vmatmul.msk.bf16.gmra.mxu0 %vm97_vm0, %v55_v17  ;;  %302 = vmatpush.msra.mxu3 %v1148_v38 }
  0x22   :  { %796 = vmatmul.msk.bf16.gmra.mxu1 %vm97_vm0, %v55_v17 }
  0x23   :  { %814 = vmatmul.msk.bf16.gmra.mxu2 %vm97_vm0, %v55_v17  ;;  %303 = vmatpush.msra.mxu3 %v1160_v43  ;;  %v1228_v17 = vld [vmem:[%s1382_s4 + $0x38] sm:$0xff] }
  0x25   :  { %304 = vmatpush.msra.mxu3 %v1178_v53 }
  0x27   :  { %670 = vmatpush.msrb.mxu3 %v1071_v18 }
  0x29   :  { %671 = vmatpush.msrb.mxu3 %v1077_v19 }
  0x2b   :  { %672 = vmatpush.msrb.mxu3 %v1083_v20 }
  0x2d   :  { %673 = vmatpush.msrb.mxu3 %v1089_v21 }
  0x2f   :  { %674 = vmatpush.msrb.mxu3 %v1095_v22 }
  0x31   :  { %675 = vmatpush.msrb.mxu3 %v1101_v23 }
  0x33   :  { %676 = vmatpush.msrb.mxu3 %v1107_v26 }
  0x35   :  { %677 = vmatpush.msrb.mxu3 %v1113_v27 }
  0x37   :  { %678 = vmatpush.msrb.mxu3 %v1119_v28 }
  0x39   :  { %679 = vmatpush.msrb.mxu3 %v1125_v30 }
  0x3b   :  { %680 = vmatpush.msrb.mxu3 %v1131_v33 }
  0x3d   :  { %681 = vmatpush.msrb.mxu3 %v1136_v34  ;;  %v964_v34 = vld [vmem:[%s1383_s2 + $0x78] sm:$0xff] }
  0x3e   :  { %619 = vmatpush.bf16.msrb.mxu2 %v964_v34 }
  0x3f   :  { %682 = vmatpush.msrb.mxu3 %v1142_v36  ;;  %v972_v36 = vld [vmem:[%s1383_s2 + $0x38] sm:$0xff] }
  0x40   :  { %432 = vmatpush.bf16.msrb.mxu0 %v972_v36 }
  0x41   :  { %683 = vmatpush.msrb.mxu3 %v1148_v38  ;;  %v980_v38 = vld [vmem:[%s1383_s2 + $0xb8] sm:$0xff] }
  0x42   :  { %516 = vmatpush.bf16.msrb.mxu1 %v980_v38 }
  0x43   :  { %684 = vmatpush.msrb.mxu3 %v1160_v43  ;;  %v963_v43 = vld [vmem:[%s1383_s2 + $0x70] sm:$0xff] }
  0x44   :  { %620 = vmatpush.bf16.msrb.mxu2 %v963_v43 }
  0x45   :  { %685 = vmatpush.msrb.mxu3 %v1178_v53  ;;  %v979_v53 = vld [vmem:[%s1383_s2 + $0xb0] sm:$0xff] }
  0x46   :  { %517 = vmatpush.bf16.msrb.mxu1 %v979_v53 }
  0x8e   :  { %v113_v24 = vpop.f32.mrf.mxu0 }
  0x8f   :  { %v165_v25 = vpop.f32.mrf.mxu1  ;;  %v180_v37 = vrot.slane %v113_v24, 7 }
  0x90   :  { %v197_v45 = vrot.slane %v165_v25, 1 }
  0x91   :  { %v191_v44 = vsel %vm179_vm1, 0.0, %v180_v37 }
  0x92   :  { %v209_v56 = vmul.f32 %v191_v44, %v1166_v46 }
  0x96   :  { %v246_v29 = vpop.f32.mrf.mxu2  ;;  %v115_v31 = vpop.f32.mrf.mxu0 }
  0x97   :  { %v167_v32 = vpop.f32.mrf.mxu1  ;;  %v181_v35 = vrot.slane %v115_v31, 7  ;;  %v247_v63 = vadd.f32 %v246_v29, %v209_v56  ;;  %v970_v56 = vld [vmem:[%s1383_s2 + $0x28] sm:$0xff] }
  0x98   :  { %v198_v39 = vrot.slane %v167_v32, 1 }
  0x99   :  { %v182_v41 = vsel %vm179_vm1, %v180_v37, %v181_v35 }
  0x9a   :  { %v210_v49 = vmul.f32 %v182_v41, %v1153_v40  ;;  %v199_v55 = vsel %vm196_vm2, %v197_v45, %v198_v39 }
  0x9b   :  { %v256_v59 = vmul.f32 %v1183_v54, %v199_v55  ;;  %v962_v55 = vld [vmem:[%s1383_s2 + $0x68] sm:$0xff] }
  0x9c   :  { %621 = vmatpush.bf16.msrb.mxu2 %v962_v55 }
  0x9d   :  { %v1203_v5 = vadd.f32 %v256_v59, %v247_v63  ;;  %v969_v59 = vld [vmem:[%s1383_s2 + $0x20] sm:$0xff]  ;;  %v968_v63 = vld [vmem:[%s1383_s2 + $0x18] sm:$0xff] }
  0x9e   :  { %v248_v42 = vpop.f32.mrf.mxu2  ;;  %v118_v47 = vpop.f32.mrf.mxu0 }
  0x9f   :  { %v170_v48 = vpop.f32.mrf.mxu1  ;;  %v183_v50 = vrot.slane %v118_v47, 7  ;;  %v249_v60 = vadd.f32 %v248_v42, %v210_v49  ;;  %v273_v16 = vmul.f32 %v1203_v5, %v1203_v5 }
  0xa0   :  { %v200_v52 = vrot.slane %v170_v48, 1 }
  0xa1   :  { %v184_v62 = vsel %vm179_vm1, %v181_v35, %v183_v50 }
  0xa2   :  { %v201_v57 = vsel %vm196_vm2, %v198_v39, %v200_v52  ;;  %v211_v2 = vmul.f32 %v184_v62, %v1195_v61  ;;  %v960_v62 = vld [vmem:[%s1383_s2 + $0x58] sm:$0xff] }
  0xa3   :  { %v257_v58 = vmul.f32 %v1173_v51, %v201_v57  ;;  %v978_v57 = vld [vmem:[%s1383_s2 + $0xa8] sm:$0xff] }
  0xa4   :  { %518 = vmatpush.bf16.msrb.mxu1 %v978_v57 }
  0xa5   :  { %v1199_v0 = vadd.f32 %v257_v58, %v249_v60  ;;  %v961_v58 = vld [vmem:[%s1383_s2 + $0x60] sm:$0xff] }
  0xa6   :  { %v251_v1 = vpop.f32.mrf.mxu2  ;;  %v120_v3 = vpop.f32.mrf.mxu0  ;;  %v977_v60 = vld [vmem:[%s1383_s2 + $0xa0] sm:$0xff]  ;;  %622 = vmatpush.bf16.msrb.mxu2 %v961_v58 }
  0xa7   :  { %v172_v4 = vpop.f32.mrf.mxu1  ;;  %v185_v6 = vrot.slane %v120_v3, 7  ;;  %v274_v10 = vmul.f32 %v1199_v0, %v1199_v0  ;;  %v252_v13 = vadd.f32 %v251_v1, %v211_v2  ;;  %v264_v20 = vadd.f32 %v1199_v0, %v1203_v5  ;;  %v976_v1 = vld [vmem:[%s1383_s2 + $0x98] sm:$0xff] }
  0xa8   :  { %v202_v8 = vrot.slane %v172_v4, 1  ;;  %519 = vmatpush.bf16.msrb.mxu1 %v977_v60  ;;  %v959_v4 = vld [vmem:[%s1383_s2 + $0x50] sm:$0xff] }
  0xa9   :  { %v186_v12 = vsel %vm179_vm1, %v183_v50, %v185_v6  ;;  %v277_v24 = vadd.f32 %v274_v10, %v273_v16  ;;  %v967_v6 = vld [vmem:[%s1383_s2 + $0x10] sm:$0xff]  ;;  %v957_v16 = vld [vmem:[%s1383_s2 + $0x40] sm:$0xff] }
  0xaa   :  { %v203_v11 = vsel %vm196_vm2, %v200_v52, %v202_v8  ;;  %v212_v15 = vmul.f32 %v186_v12, %v1213_v9  ;;  %v208_v18 = vsel %vm196_vm2, %v202_v8, 0.0  ;;  %v971_v52 = vld [vmem:[%s1383_s2 + $0x30] sm:$0xff]  ;;  %623 = vmatpush.bf16.msrb.mxu2 %v960_v62  ;;  %v958_v12 = vld [vmem:[%s1383_s2 + $0x48] sm:$0xff] }
  0xab   :  { %v258_v14 = vmul.f32 %v1208_v7, %v203_v11  ;;  %v259_v25 = vmul.f32 %v1228_v17, %v208_v18  ;;  %433 = vmatpush.bf16.msrb.mxu0 %v971_v52  ;;  %v975_v8 = vld [vmem:[%s1383_s2 + $0x90] sm:$0xff]  ;;  %v965_v18 = vld [vmem:[%s1383_s2] sm:$0xff] }
  0xac   :  { %520 = vmatpush.bf16.msrb.mxu1 %v976_v1 }
  0xad   :  { %v1232_v19 = vadd.f32 %v258_v14, %v252_v13  ;;  %v966_v13 = vld [vmem:[%s1383_s2 + $0x8] sm:$0xff] }
  0xae   :  { %v253_v21 = vpop.f32.mrf.mxu2  ;;  %624 = vmatpush.bf16.msrb.mxu2 %v959_v4  ;;  %v974_v14 = vld [vmem:[%s1383_s2 + $0x88] sm:$0xff] }
  0xaf   :  { %v275_v29 = vmul.f32 %v1232_v19, %v1232_v19  ;;  %v254_v31 = vadd.f32 %v253_v21, %v212_v15  ;;  %v265_v32 = vadd.f32 %v264_v20, %v1232_v19  ;;  %434 = vmatpush.bf16.msrb.mxu0 %v970_v56  ;;  %v973_v21 = vld [vmem:[%s1383_s2 + $0x80] sm:$0xff] }
  0xb0   :  { %521 = vmatpush.bf16.msrb.mxu1 %v975_v8 }
  0xb1   :  { %v1242_v22 = vadd.f32 %v259_v25, %v254_v31  ;;  %v278_v35 = vadd.f32 %v277_v24, %v275_v29 }
  0xb2   :  { %625 = vmatpush.bf16.msrb.mxu2 %v958_v12 }
  0xb3   :  { %v266_v37 = vadd.f32 %v265_v32, %v1242_v22  ;;  %v276_v23 = vmul.f32 %v1242_v22, %v1242_v22  ;;  %435 = vmatpush.bf16.msrb.mxu0 %v969_v59 }
  0xb4   :  { %522 = vmatpush.bf16.msrb.mxu1 %v974_v14 }
  0xb5   :  { %v267_v39 = vrot.slane %v266_v37, 4  ;;  %v279_v41 = vadd.f32 %v278_v35, %v276_v23 }
  0xb6   :  { %626 = vmatpush.bf16.msrb.mxu2 %v957_v16 }
  0xb7   :  { %v268_v42 = vadd.f32 %v267_v39, %v266_v37  ;;  %v280_v44 = vrot.slane %v279_v41, 4  ;;  %436 = vmatpush.bf16.msrb.mxu0 %v968_v63  ;;  %v1333_v37 = vld [vmem:[%s1384_s5] sm:$0xff] }
  0xb8   :  { %523 = vmatpush.bf16.msrb.mxu1 %v973_v21 }
  0xb9   :  { %v269_v26 = vrot.slane %v268_v42, 2  ;;  %v281_v45 = vadd.f32 %v280_v44, %v279_v41 }
  0xbb   :  { %v270_v27 = vadd.f32 %v269_v26, %v268_v42  ;;  %v282_v47 = vrot.slane %v281_v45, 2  ;;  %437 = vmatpush.bf16.msrb.mxu0 %v967_v6 }
  0xbd   :  { %v271_v48 = vrot.slane %v270_v27, 1  ;;  %v283_v49 = vadd.f32 %v282_v47, %v281_v45 }
  0xbf   :  { %v284_v28 = vrot.slane %v283_v49, 1  ;;  %v272_v30 = vadd.f32 %v271_v48, %v270_v27  ;;  %438 = vmatpush.bf16.msrb.mxu0 %v966_v13 }
  0xc1   :  { %v285_v50 = vadd.f32 %v284_v28, %v283_v49 }
  0xc3   :  { %v286_v33 = vsel %vm179_vm1, %v272_v30, %v285_v50  ;;  %439 = vmatpush.bf16.msrb.mxu0 %v965_v18 }
  0xc4   :  { %815 = vmatmul.msk.f32.vlgmr.msra.gmra.mxu3 %vm287_vm3, %v286_v33 }
 0x147   :  { %v306_v2 = vpop.f32.mrf.mxu3 }
 0x148   :  { %v309_v3 = vmul.f32 0.001953125, %v306_v2 }
 0x14a   :  { %v310_v10 = vmul.f32 %v309_v3, %v309_v3 }
 0x14c   :  { %v312_v11 = vrot.slane %v310_v10, 7 }
 0x14e   :  { %v314_v15 = vsub.f32 %v309_v3, %v312_v11 }
 0x150   :  { %v315_v20 = vadd.f32 1e-05, %v314_v15 }
 0x152   :  { %981 = vrsqrt.f32 %v315_v20  ;;  %vm322_vm5 = vweird.f32 %v315_v20 }
 0x158   :  { %v982_v24 = vpop.eup %981 }
 0x159   :  { %v317_v25 = vmul.f32 %v982_v24, %v315_v20  ;;  %vm323_vm4 = vweird.f32 %v982_v24 }
 0x15a   :  { %vm324_vm6 = vmor %vm322_vm5, %vm323_vm4 }
 0x15b   :  { %v318_v29 = vmul.f32 %v982_v24, %v317_v25 }
 0x15d   :  { %v319_v31 = vmul.f32 0.5, %v318_v29 }
 0x15f   :  { %v320_v32 = vsub.f32 1.5, %v319_v31 }
 0x161   :  { %v321_v35 = vmul.f32 %v982_v24, %v320_v32 }
 0x163   :  { %v325_v23 = vsel %vm324_vm6, %v982_v24, %v321_v35 }
 0x164   :  { %v327_v39 = vrot.slane %v325_v23, 1 }
 0x166   :  { %v329_v41 = vmul.f32 %v327_v39, %v1333_v37 }
 0x168   :  { %v330_v42 = vmul.f32 %v329_v41, %v309_v3  ;;  %v335_v26 = vperm.slane %v329_v41, 0 }
 0x16a   :  { %v332_v44 = vrot.slane %v330_v42, 7  ;;  %v336_v47 = vmul.f32 %v335_v26, %v1203_v5  ;;  %v337_v48 = vmul.f32 %v335_v26, %v1199_v0  ;;  %v338_v34 = vmul.f32 %v335_v26, %v1232_v19 }
 0x16b   :  { %v339_v36 = vmul.f32 %v335_v26, %v1242_v22 }
 0x16c   :  { %v334_v45 = vsub.f32 %v1333_v37, %v332_v44 }
 0x16e   :  { %v340_v27 = vperm.slane %v334_v45, 1 }
 0x170   :  { %v341_v49 = vadd.f32 %v340_v27, %v336_v47  ;;  %v342_v28 = vadd.f32 %v340_v27, %v337_v48  ;;  %v343_v38 = vadd.f32 %v340_v27, %v338_v34  ;;  %v344_v43 = vadd.f32 %v340_v27, %v339_v36 }
 0x172   :  { %v345_v30 = vmax.f32 %v341_v49, 0.0  ;;  %v346_v50 = vmax.f32 %v342_v28, 0.0  ;;  %v347_v52 = vmax.f32 %v343_v38, 0.0  ;;  %v348_v53 = vmax.f32 %v344_v43, 0.0 }
 0x174   :  { %v349_v33 = vpack.c.bf16 %v346_v50, %v345_v30  ;;  %v350_v55 = vpack.c.bf16 %v348_v53, %v347_v52 }
 0x176   :  { %440 = vmatmul.bf16.vlgmr.msrb.gmra.mxu0 %v349_v33  ;;  %524 = vmatmul.bf16.vlgmr.msrb.gmra.mxu1 %v349_v33 }
 0x177   :  { %627 = vmatmul.bf16.vlgmr.msrb.gmra.mxu2 %v349_v33 }
 0x186   :  { %445 = vmatmul.bf16.gmra.mxu0 %v350_v55  ;;  %529 = vmatmul.bf16.gmra.mxu1 %v350_v55 }
 0x187   :  { %632 = vmatmul.bf16.gmra.mxu2 %v350_v55 }
 0x1f3   :  { %v441_v0 = vpop.f32.mrf.mxu0  ;;  %v525_v5 = vpop.f32.mrf.mxu1 }
 0x1f4   :  { %v539_v60 = vrot.slane %v441_v0, 7  ;;  %v555_v1 = vrot.slane %v525_v5, 1 }
 0x1f6   :  { %v550_v22 = vsel %vm179_vm1, 0.0, %v539_v60 }
 0x1f7   :  { %v567_v11 = vmul.f32 %v550_v22, %v1166_v46 }
 0x1fa   :  { %v628_v56 = vpop.f32.mrf.mxu2 }
 0x1fb   :  { %v443_v57 = vpop.f32.mrf.mxu0  ;;  %v527_v58 = vpop.f32.mrf.mxu1  ;;  %v629_v18 = vadd.f32 %v628_v56, %v567_v11 }
 0x1fc   :  { %v540_v59 = vrot.slane %v443_v57, 7  ;;  %v556_v62 = vrot.slane %v527_v58, 1 }
 0x1fe   :  { %v541_v19 = vsel %vm179_vm1, %v539_v60, %v540_v59  ;;  %v557_v10 = vsel %vm196_vm2, %v555_v1, %v556_v62 }
 0x1ff   :  { %v568_v4 = vmul.f32 %v541_v19, %v1153_v40  ;;  %v638_v14 = vmul.f32 %v1183_v54, %v557_v10 }
 0x201   :  { %v642_v29 = vadd.f32 %v638_v14, %v629_v18 }
 0x202   :  { %v630_v63 = vpop.f32.mrf.mxu2 }
 0x203   :  { %v446_v2 = vpop.f32.mrf.mxu0  ;;  %v530_v3 = vpop.f32.mrf.mxu1  ;;  %v631_v15 = vadd.f32 %v630_v63, %v568_v4  ;;  %v655_v41 = vmul.f32 %v642_v29, %v642_v29 }
 0x204   :  { %v542_v6 = vrot.slane %v446_v2, 7  ;;  %v558_v8 = vrot.slane %v530_v3, 1 }
 0x206   :  { %v559_v12 = vsel %vm196_vm2, %v556_v62, %v558_v8  ;;  %v543_v16 = vsel %vm179_vm1, %v540_v59, %v542_v6 }
 0x207   :  { %v639_v13 = vmul.f32 %v1173_v51, %v559_v12  ;;  %v569_v40 = vmul.f32 %v543_v16, %v1195_v61 }
 0x209   :  { %v1350_v20 = vadd.f32 %v639_v13, %v631_v15 }
 0x20a   :  { %v633_v21 = vpop.f32.mrf.mxu2 }
 0x20b   :  { %v448_v24 = vpop.f32.mrf.mxu0  ;;  %v532_v25 = vpop.f32.mrf.mxu1  ;;  %v656_v32 = vmul.f32 %v1350_v20, %v1350_v20  ;;  %v634_v35 = vadd.f32 %v633_v21, %v569_v40  ;;  %v646_v44 = vadd.f32 %v1350_v20, %v642_v29 }
 0x20c   :  { %v544_v31 = vrot.slane %v448_v24, 7  ;;  %v560_v46 = vrot.slane %v532_v25, 1 }
 0x20d   :  { %v659_v45 = vadd.f32 %v656_v32, %v655_v41 }
 0x20e   :  { %v561_v51 = vsel %vm196_vm2, %v558_v8, %v560_v46  ;;  %v545_v54 = vsel %vm179_vm1, %v542_v6, %v544_v31  ;;  %v566_v61 = vsel %vm196_vm2, %v560_v46, 0.0 }
 0x20f   :  { %v640_v23 = vmul.f32 %v1208_v7, %v561_v51  ;;  %v570_v39 = vmul.f32 %v545_v54, %v1213_v9  ;;  %v641_v27 = vmul.f32 %v1228_v17, %v566_v61 }
 0x211   :  { %v644_v42 = vadd.f32 %v640_v23, %v634_v35 }
 0x212   :  { %v635_v26 = vpop.f32.mrf.mxu2 }
 0x213   :  { %v657_v47 = vmul.f32 %v644_v42, %v644_v42  ;;  %v636_v48 = vadd.f32 %v635_v26, %v570_v39  ;;  %v647_v49 = vadd.f32 %v646_v44, %v644_v42 }
 0x215   :  { %v645_v28 = vadd.f32 %v641_v27, %v636_v48  ;;  %v660_v30 = vadd.f32 %v659_v45, %v657_v47 }
 0x217   :  { %v648_v50 = vadd.f32 %v647_v49, %v645_v28  ;;  %v658_v33 = vmul.f32 %v645_v28, %v645_v28 }
 0x219   :  { %v649_v7 = vrot.slane %v648_v50, 4  ;;  %v661_v34 = vadd.f32 %v660_v30, %v658_v33 }
 0x21b   :  { %v650_v9 = vadd.f32 %v649_v7, %v648_v50  ;;  %v662_v36 = vrot.slane %v661_v34, 4 }
 0x21d   :  { %v651_v38 = vrot.slane %v650_v9, 2  ;;  %v663_v43 = vadd.f32 %v662_v36, %v661_v34 }
 0x21f   :  { %v652_v52 = vadd.f32 %v651_v38, %v650_v9  ;;  %v664_v53 = vrot.slane %v663_v43, 2 }
 0x221   :  { %v653_v55 = vrot.slane %v652_v52, 1  ;;  %v665_v0 = vadd.f32 %v664_v53, %v663_v43 }
 0x223   :  { %v666_v5 = vrot.slane %v665_v0, 1  ;;  %v654_v56 = vadd.f32 %v653_v55, %v652_v52 }
 0x225   :  { %v667_v17 = vadd.f32 %v666_v5, %v665_v0 }
 0x227   :  { %v668_v57 = vsel %vm179_vm1, %v654_v56, %v667_v17 }
 0x228   :  { %944 = vmatmul.msk.f32.vlgmr.msrb.gmra.mxu3 %vm287_vm3, %v668_v57 }
 0x2ab   :  { %v687_v58 = vpop.f32.mrf.mxu3 }
 0x2ac   :  { %v690_v59 = vmul.f32 0.001953125, %v687_v58 }
 0x2ae   :  { %v691_v60 = vmul.f32 %v690_v59, %v690_v59 }
 0x2b0   :  { %v693_v62 = vrot.slane %v691_v60, 7 }
 0x2b2   :  { %v695_v19 = vsub.f32 %v690_v59, %v693_v62 }
 0x2b4   :  { %v696_v63 = vadd.f32 1e-05, %v695_v19 }
 0x2b6   :  { %983 = vrsqrt.f32 %v696_v63  ;;  %vm703_vm8 = vweird.f32 %v696_v63 }
 0x2bc   :  { %v984_v22 = vpop.eup %983 }
 0x2bd   :  { %v698_v1 = vmul.f32 %v984_v22, %v696_v63  ;;  %vm704_vm7 = vweird.f32 %v984_v22 }
 0x2be   :  { %vm705_vm9 = vmor %vm703_vm8, %vm704_vm7 }
 0x2bf   :  { %v699_v2 = vmul.f32 %v984_v22, %v698_v1 }
 0x2c1   :  { %v700_v3 = vmul.f32 0.5, %v699_v2 }
 0x2c3   :  { %v701_v4 = vsub.f32 1.5, %v700_v3 }
 0x2c5   :  { %v702_v6 = vmul.f32 %v984_v22, %v701_v4 }
 0x2c7   :  { %v706_v8 = vsel %vm705_vm9, %v984_v22, %v702_v6 }
 0x2c8   :  { %v708_v10 = vrot.slane %v706_v8, 7 }
 0x2ca   :  { %v710_v11 = vmul.f32 %v708_v10, %v1333_v37 }
 0x2cc   :  { %v712_v12 = vrot.slane %v710_v11, 2  ;;  %v719_v14 = vperm.slane %v710_v11, 2 }
 0x2ce   :  { %v714_v13 = vmul.f32 %v712_v12, %v690_v59  ;;  %v720_v18 = vmul.f32 %v719_v14, %v642_v29  ;;  %v721_v21 = vmul.f32 %v719_v14, %v1350_v20  ;;  %v722_v40 = vmul.f32 %v719_v14, %v644_v42 }
 0x2cf   :  { %v723_v24 = vmul.f32 %v719_v14, %v645_v28 }
 0x2d0   :  { %v716_v15 = vrot.slane %v714_v13, 5 }
 0x2d2   :  { %v718_v16 = vsub.f32 %v1333_v37, %v716_v15 }
 0x2d4   :  { %v724_v25 = vperm.slane %v718_v16, 3 }
 0x2d6   :  { %v725_v31 = vadd.f32 %v724_v25, %v720_v18  ;;  %v726_v46 = vadd.f32 %v724_v25, %v721_v21  ;;  %v727_v32 = vadd.f32 %v724_v25, %v722_v40  ;;  %v728_v51 = vadd.f32 %v724_v25, %v723_v24 }
 0x2d8   :  { %v729_v54 = vmax.f32 %v725_v31, 0.0  ;;  %v730_v35 = vmax.f32 %v726_v46, 0.0  ;;  %v731_v23 = vmax.f32 %v727_v32, 0.0  ;;  %v732_v39 = vmax.f32 %v728_v51, 0.0 }
 0x2da   :  { %733 = vst [vmem:[%s1385_s6] sm:$0xff] %v729_v54 }
 0x2db   :  { %734 = vst [vmem:[%s1385_s6 + $0x8] sm:$0xff] %v730_v35 }
 0x2dc   :  { %735 = vst [vmem:[%s1385_s6 + $0x10] sm:$0xff] %v731_v23 }
 0x2dd   :  { %736 = vst [vmem:[%s1385_s6 + $0x18] sm:$0xff] %v732_v39 }

</bundles_post_ra>
